<compile_context>
chip_gen: v7x
topology: tpu7x:2x2x1
jax: 0.10.0
libtpu: 0.0.40
codegen_flags: <defaults>
</compile_context>

<pallas_src>
import functools

import jax
import jax.numpy as jnp
from jax.experimental import pallas as pl
from jax.experimental.pallas import tpu as pltpu


def _frozen_bn_kernel(x_ref, ss_ref, o_ref, *, per_row):
    # Single broadcast-FMA on the VPU, in f32; cast only on the store.
    x = x_ref[...].astype(jnp.float32)
    if per_row:
        scale = ss_ref[:, 0:1]   # (tr, 1) -> broadcast along lanes
        shift = ss_ref[:, 1:2]
    else:
        scale = ss_ref[0:1, :]   # (1, tl) -> broadcast along sublanes
        shift = ss_ref[1:2, :]
    o_ref[...] = (x * scale + shift).astype(o_ref.dtype)


def _round_up(v, m):
    return ((v + m - 1) // m) * m


def _device_budget():
    """Return (per-buffer tile budget bytes, vmem_limit_bytes or None)."""
    try:
        info = pltpu.get_tpu_info()
        vmem = int(getattr(info, "vmem_capacity_bytes", 0) or 0)
    except Exception:
        vmem = 0
    if vmem and vmem <= (80 << 20):
        # v7x-class: 64 MiB VMEM per TC, fastest HBM -> bigger tiles, capped limit.
        return 6 << 20, 48 << 20
    if vmem:
        # v5e/v6e-class: 128 MiB physical VMEM; raise the scoped limit explicitly.
        return 4 << 20, 64 << 20
    # Unknown / query failed: fit the smallest (v5e, 16 MiB) default scoped VMEM.
    return 2 << 20, None


def _choose_tiles(M, L, itemsize, sub, budget):
    """Pick (tr, tl) for a (M, L) slab; tr multiple of `sub` (or == M),
    tl multiple of 128 (or == L)."""
    row_bytes = L * itemsize
    lanes_tileable = (L % 128 == 0)

    if lanes_tileable and sub * row_bytes > budget:
        # Giant lane extent: tile the lane axis too (multiples of 128) and keep
        # several sublane groups of rows per tile (better than the bare minimum).
        tr = min(4 * sub, _round_up(M, sub))
        if tr >= M:
            tr = M
        tl = (budget // max(tr * itemsize, 1)) // 128 * 128
        tl = max(128, min(tl, L))
        return tr, tl

    # Lane axis taken whole: lane-dense, unmasked stores.
    tl = L
    tr = max(sub, (budget // max(row_bytes, 1)) // sub * sub)
    if tr >= M:
        tr = M
        # Megacore: keep >=2 row blocks when the tensor is big enough to matter.
        if M >= 2 * sub and M * row_bytes >= (2 << 20):
            tr = _round_up((M + 1) // 2, sub)
    return tr, tl


def frozen_batch_norm_2d(x_nchw, weight, bias, running_mean, running_var,
                         eps=1e-5, donate_input=False):
    """FrozenBatchNorm2d forward. x_nchw: (N, C, H, W); params: (C,) each."""
    N, C, H, W = x_nchw.shape
    L = H * W
    dtype = x_nchw.dtype
    itemsize = jnp.dtype(dtype).itemsize
    sub = {4: 8, 2: 16, 1: 32}.get(itemsize, 8)   # sublane packing per dtype

    # Hoisted frozen-stat folding, kept in f32 (precision matches PyTorch ref).
    f32 = jnp.float32
    scale = weight.astype(f32) * jax.lax.rsqrt(running_var.astype(f32) + jnp.asarray(eps, f32))
    shift = bias.astype(f32) - running_mean.astype(f32) * scale

    budget, vmem_limit = _device_budget()

    # Layout choice: keep the output last dim lane-dense whenever possible.
    per_row = (L % 128 == 0) or ((C * L) % 128 != 0)
    if per_row:
        M2, L2 = N * C, L                         # rows = (n, c), lanes = spatial
        x2 = x_nchw.reshape(M2, L2)               # free, no-copy reshape
        ss = jnp.stack([jnp.tile(scale, N), jnp.tile(shift, N)], axis=1)   # (M2, 2) f32
    else:
        # Small / non-128 H*W (e.g. 7x7, 14x14): rows = N, lanes = C*H*W.
        M2, L2 = N, C * L
        x2 = x_nchw.reshape(M2, L2)
        ss = jnp.stack([jnp.repeat(scale, L), jnp.repeat(shift, L)], axis=0)  # (2, L2) f32

    tr, tl = _choose_tiles(M2, L2, itemsize, sub, budget)
    # Ragged edge blocks are masked by Pallas: no jnp.pad / out[:M] HBM copies.
    grid = (pl.cdiv(M2, tr), pl.cdiv(L2, tl))

    if per_row:
        ss_spec = pl.BlockSpec((tr, 2), lambda i, j: (i, 0))
    else:
        ss_spec = pl.BlockSpec((2, tl), lambda i, j: (0, j))

    cp_kwargs = dict(dimension_semantics=("parallel", "parallel"))
    if vmem_limit is not None:
        cp_kwargs["vmem_limit_bytes"] = int(vmem_limit)

    out = pl.pallas_call(
        functools.partial(_frozen_bn_kernel, per_row=per_row),
        out_shape=jax.ShapeDtypeStruct((M2, L2), dtype),
        grid_spec=pltpu.PrefetchScalarGridSpec(
            num_scalar_prefetch=0,
            grid=grid,
            in_specs=[
                pl.BlockSpec((tr, tl), lambda i, j: (i, j)),   # activation tile
                ss_spec,                                       # packed scale/shift
            ],
            out_specs=pl.BlockSpec((tr, tl), lambda i, j: (i, j)),
        ),
        compiler_params=pltpu.CompilerParams(**cp_kwargs),
        input_output_aliases=({0: 0} if donate_input else {}),
    )(x2, ss)

    return out.reshape(N, C, H, W)


def _reference(x, w, b, rm, rv, eps=1e-5):
    scale = (w * jax.lax.rsqrt(rv + eps)).reshape(1, -1, 1, 1)
    bias = (b - rm * (w * jax.lax.rsqrt(rv + eps))).reshape(1, -1, 1, 1)
    return x * scale + bias


def _make_params(C, key):
    kw, kb, km, kv = jax.random.split(key, 4)
    weight = jnp.ones((C,), jnp.float32) + 0.1 * jax.random.normal(kw, (C,), jnp.float32)
    bias = 0.1 * jax.random.normal(kb, (C,), jnp.float32)
    running_mean = 0.1 * jax.random.normal(km, (C,), jnp.float32)
    running_var = jnp.ones((C,), jnp.float32) + 0.1 * jnp.abs(
        jax.random.normal(kv, (C,), jnp.float32))
    return weight, bias, running_mean, running_var


if __name__ == "__main__":
    key = jax.random.PRNGKey(0)
    k1x, k1p, k2x, k2p = jax.random.split(key, 4)

    # Case 1: lane-dense spatial extent (H*W multiple of 128) -> per-row layout.
    N, C, H, W = 2, 4, 16, 16
    x = jax.random.normal(k1x, (N, C, H, W), dtype=jnp.float32)
    w, b, rm, rv = _make_params(C, k1p)
    out = jax.block_until_ready(frozen_batch_norm_2d(x, w, b, rm, rv))
    ref = _reference(x, w, b, rm, rv)
    assert out.shape == (N, C, H, W)
    assert jnp.allclose(out, ref, atol=1e-5, rtol=1e-5), "mismatch vs reference (case 1)"

    # Case 2: small non-128 spatial (ResNet-style 7x7) -> rows=N, lanes=C*H*W layout.
    N2, C2, H2, W2 = 2, 256, 7, 7
    x2 = jax.random.normal(k2x, (N2, C2, H2, W2), dtype=jnp.float32)
    w2, b2, rm2, rv2 = _make_params(C2, k2p)
    out2 = jax.block_until_ready(frozen_batch_norm_2d(x2, w2, b2, rm2, rv2))
    ref2 = _reference(x2, w2, b2, rm2, rv2)
    assert out2.shape == (N2, C2, H2, W2)
    assert jnp.allclose(out2, ref2, atol=1e-5, rtol=1e-5), "mismatch vs reference (case 2)"

    print("KERNEL_OK")
</pallas_src>

<mosaic_0001>
module attributes {stable_mosaic.version = 11 : i64} {
  func.func @_frozen_bn_kernel(%arg0: i32, %arg1: i32, %arg2: memref<8x256xf32, #tpu.memory_space<vmem>>, %arg3: memref<8x2xf32, #tpu.memory_space<vmem>>, %arg4: memref<8x256xf32, #tpu.memory_space<vmem>>) attributes {dimension_semantics = [#tpu.dimension_semantics<parallel>, #tpu.dimension_semantics<parallel>], iteration_bounds = array<i64: 1, 1>, scalar_prefetch = 0 : i64, scratch_operands = 0 : i64, tpu.core_type = #tpu.core_type<tc>, window_params = [{transform_indices = @transform_0, window_bounds = array<i64: 8, 256>}, {transform_indices = @transform_1, window_bounds = array<i64: 8, 2>}, {transform_indices = @transform_2, window_bounds = array<i64: 8, 256>}]} {
    %c0 = arith.constant 0 : index
    %c0_0 = arith.constant 0 : index
    %0 = vector.load %arg2[%c0, %c0_0] : memref<8x256xf32, #tpu.memory_space<vmem>>, vector<8x256xf32>
    %c0_1 = arith.constant 0 : index
    %c0_2 = arith.constant 0 : index
    %1 = vector.load %arg3[%c0_1, %c0_2] : memref<8x2xf32, #tpu.memory_space<vmem>>, vector<8x1xf32>
    %c0_3 = arith.constant 0 : index
    %c1 = arith.constant 1 : index
    %2 = vector.load %arg3[%c0_3, %c1] : memref<8x2xf32, #tpu.memory_space<vmem>>, vector<8x1xf32>
    %3 = vector.broadcast %1 : vector<8x1xf32> to vector<8x256xf32>
    %4 = arith.mulf %0, %3 : vector<8x256xf32>
    %5 = vector.broadcast %2 : vector<8x1xf32> to vector<8x256xf32>
    %6 = arith.addf %4, %5 : vector<8x256xf32>
    %c0_4 = arith.constant 0 : index
    %c0_5 = arith.constant 0 : index
    %7 = vector.load %arg4[%c0_4, %c0_5] : memref<8x256xf32, #tpu.memory_space<vmem>>, vector<8x256xf32>
    tpu.vector_store %arg4[%c0_4, %c0_5], %6 {strides = array<i32>} : memref<8x256xf32, #tpu.memory_space<vmem>>, vector<8x256xf32>,
    return
  }
  func.func @transform_0(%arg0: i32, %arg1: i32) -> (i32, i32) {
    %c0_i32 = arith.constant 0 : i32
    return %arg0, %arg1 : i32, i32
  }
  func.func @transform_1(%arg0: i32, %arg1: i32) -> (i32, i32) {
    %c0_i32 = arith.constant 0 : i32
    %c0_i32_0 = arith.constant 0 : i32
    return %arg0, %c0_i32 : i32, i32
  }
  func.func @transform_2(%arg0: i32, %arg1: i32) -> (i32, i32) {
    %c0_i32 = arith.constant 0 : i32
    return %arg0, %arg1 : i32, i32
  }
}

</mosaic_0001>

<bundles_post_ra>
// kernel: tpu_custom_call.1
= control target key start
LH: loop header
LB: loop body
LE: loop exit
PB: predicated region body
PF: predicated region fallthrough
CT: control target
= control target key end

     0   :  { %7 = vsyncpa [#allocation3], 0  ;;  %s157_s0 = inlined_call_operand.hbm [shape: f32[8,256], index: 0, kind: input, shape index: {}]   ;;  %s158_s1 = inlined_call_operand.vmem [shape: f32[8,2], index: 1, kind: input, shape index: {}]   ;;  %s159_s2 = inlined_call_operand.hbm [shape: f32[8,256], index: 2, kind: output, shape index: {}]  }
   0x1   :  { %8 = vsyncpa [#allocation4], 0  ;;  %s111_s9 = smov [#allocation2]   ;;  %s63_s13 = scalar_lea.hbm %s157_s0, 256 }
   0x2   :  { %s15_s10 = sshll.u32 %s111_s9, 4  ;;  %p64_p0 = scmp.ne.s32.totalorder %s157_s0, %s63_s13  ;;  %s16_s10 = int_to_ptr.vmem [resolvable:$true] %s15_s10 }
   0x3   :  { %p67_p1 = scmp.lt.u32.totalorder %s63_s13, %s157_s0 }
   0x5   :  { %p69_p2 = pnand %p67_p1, %p64_p0 }
   0x7   :  { %72 = shalt.err (!%p69_p2)
}
   0x8   :  { %s73_s18 = scalar_lea.vmem %s16_s10, 256  ;;  %p78_p4 = scmp.lt.s32.totalorder %s16_s10, %s16_s10 }
   0x9   :  { %p74_p3 = scmp.ne.s32.totalorder %s16_s10, %s73_s18  ;;  %p79_p5 = scmp.lt.s32.totalorder %s73_s18, %s73_s18 }
   0xb   :  { %p80_p6 = por %p79_p5, %p78_p4 }
   0xd   :  { %p81_p7 = pnand %p80_p6, %p74_p3 }
   0xf   :  { %84 = shalt.err (!%p81_p7)
}
  0x10   :  { %18 = dma.hbm_to_vmem [thread:$0]  %s157_s0, 256, %s16_s10, [#allocation3]  }
  0x11   :  { %107 = dma.done.wait [#allocation3], 256  }
  0x12   :  { %108 = vsyncadd [#allocation3], 4294967040  ;;  %v112_v0 = vmov 0   ;;  %v26_v1 = vld [vmem:[%s158_s1] sm:$0xff]  ;;  %v113_v2 = vmov 1   ;;  %v25_v5 = vld [vmem:[#allocation2 + $0x8] sm:$0xff] }
  0x13   :  { %61 = vset.pattern.permute.xlu0 %v112_v0  ;;  %v24_v4 = vld [vmem:[#allocation2] sm:$0xff]  ;;  %s114_s23 = smov [#allocation5]  }
  0x14   :  { %29 = vperm.xlu0 %61, %v26_v1   ;;  %s48_s24 = sshll.u32 %s114_s23, 4  ;;  %s49_s24 = int_to_ptr.vmem [resolvable:$true] %s48_s24 }
  0x15   :  { %s85_s0 = scalar_lea.vmem %s49_s24, 256  ;;  %p90_p9 = scmp.lt.s32.totalorder %s49_s24, %s49_s24 }
  0x16   :  { %p86_p8 = scmp.ne.s32.totalorder %s49_s24, %s85_s0  ;;  %p91_p10 = scmp.lt.s32.totalorder %s85_s0, %s85_s0 }
  0x18   :  { %62 = vset.pattern.permute.xlu0 %v113_v2  ;;  %p92_p11 = por %p91_p10, %p90_p9 }
  0x19   :  { %35 = vperm.xlu0 %62, %v26_v1  }
  0x1a   :  { %p93_p12 = pnand %p92_p11, %p86_p8 }
  0x93   :  { %v30_v3 = vpop.permute.xlu0 %29 }
  0x94   :  { %v32_v6 = vmul.f32 %v30_v3, %v24_v4  ;;  %v33_v7 = vmul.f32 %v30_v3, %v25_v5 }
  0x98   :  { %v36_v8 = vpop.permute.xlu0 %35 }
  0x99   :  { %v38_v9 = vadd.f32 %v36_v8, %v32_v6  ;;  %v39_v10 = vadd.f32 %v36_v8, %v33_v7 }
  0x9b   :  { %40 = vst [vmem:[#allocation5] sm:$0xff] %v38_v9  ;;  %41 = vst [vmem:[#allocation5 + $0x8] sm:$0xff] %v39_v10 }
  0x9c   :  { %96 = shalt.err (!%p93_p12)
}
  0x9d   :  { %s97_s26 = scalar_lea.hbm %s159_s2, 256 }
  0x9e   :  { %p98_p13 = scmp.ne.s32.totalorder %s159_s2, %s97_s26  ;;  %p101_p0 = scmp.lt.u32.totalorder %s97_s26, %s159_s2 }
  0xa0   :  { %p103_p1 = pnand %p101_p0, %p98_p13 }
  0xa2   :  { %106 = shalt.err (!%p103_p1)
}
  0xa3   :  { %51 = dma.vmem_to_hbm [thread:$0]  %s49_s24, 256, %s159_s2, [#allocation4]  }
  0xa4   :  { %109 = dma.done.wait [#allocation4], 256  }
  0xa5   :  { %110 = vsyncadd [#allocation4], 4294967040 }
  0xa6   :  { %55 = vsyncpa [#allocation3], 1 }
  0xa7   :  { %56 = vsyncpa [#allocation4], 1 }

</bundles_post_ra>
